<compile_context>
chip_gen: v6e
topology: v6e:2x2x1
jax: 0.10.0
libtpu: 0.0.40
codegen_flags: <defaults>
</compile_context>

<pallas_src>
import functools

import jax
import jax.numpy as jnp
from jax.experimental import pallas as pl
from jax.experimental.pallas import tpu as pltpu


def _upsample_kernel(x_ref, w_ref, b_ref, o_ref, *, H, W, pad):
    """One batch element: fused ConvTranspose2d(k=4,s=2,p=1) + bias + ReLU.

    x_ref : (1, C_in, H*W)      lane-dense input image
    w_ref : (4*C_out, 9*C_in)   folded transposed-conv weights
    b_ref : (4*C_out, 1)        bias replicated per output phase
    o_ref : (1, 4*C_out, H*W)   4 phase planes (r, s) of the 2x output
    """
    HW = H * W
    C_in = x_ref.shape[1]

    x = x_ref[0].astype(jnp.float32)                        # (C_in, HW)

    # Flat zero padding handles out-of-range rows (p-1 / p+1); column-wrap
    # masks handle out-of-range columns (q-1 / q+1).
    zeros = jnp.zeros((C_in, pad), jnp.float32)
    xp = jnp.concatenate([zeros, x, zeros], axis=1)         # (C_in, HW + 2*pad)

    # Column-wrap masks, built once and reused for all 9 taps (VPU work only).
    col = jax.lax.broadcasted_iota(jnp.int32, (C_in, HW), 1) % W
    not_first_col = col != 0
    not_last_col = col != (W - 1)

    taps = []
    for a in range(3):            # row shift:  p + (a - 1)
        for b in range(3):        # col shift:  q + (b - 1)
            d = (a - 1) * W + (b - 1)
            t = xp[:, pad + d:pad + d + HW]                 # (C_in, HW) static slice
            if b == 0:
                t = jnp.where(not_first_col, t, 0.0)
            elif b == 2:
                t = jnp.where(not_last_col, t, 0.0)
            taps.append(t)
    patches = jnp.concatenate(taps, axis=0)                 # (9*C_in, HW)

    # Single fused matmul over all 9 taps and all input channels (MXU).
    y = jnp.dot(w_ref[...].astype(jnp.float32), patches,
                preferred_element_type=jnp.float32)         # (4*C_out, HW)
    y = jnp.maximum(y + b_ref[...], 0.0)                    # bias + ReLU (VPU)
    o_ref[0] = y.astype(o_ref.dtype)


def _fold_weights(w):
    """(C_in, C_out, 4, 4) ConvTranspose2d weight -> (4*C_out, 9*C_in)."""
    C_in, C_out = w.shape[0], w.shape[1]
    wmat = jnp.zeros((4 * C_out, 9 * C_in), w.dtype)
    for r in range(2):
        for s in range(2):
            f = 2 * r + s
            for a in range(3):
                kh = r + 3 - 2 * a
                if not 0 <= kh <= 3:
                    continue
                for b in range(3):
                    kw = s + 3 - 2 * b
                    if not 0 <= kw <= 3:
                        continue
                    t = 3 * a + b
                    wmat = wmat.at[f * C_out:(f + 1) * C_out,
                                   t * C_in:(t + 1) * C_in].set(w[:, :, kh, kw].T)
    return wmat


def upsample(x, w, b):
    """F.relu(ConvTranspose2d(k=4, s=2, p=1)(x)).  x: (N, C_in, H, W) NCHW."""
    N, C_in, H, W = x.shape
    C_out = w.shape[1]
    HW = H * W
    # Flat zero pad: >= W+1 so every +/-1-row shift stays inside the pad,
    # rounded to a lane multiple so the central slice stays lane-aligned.
    pad = max(128, ((W + 1 + 127) // 128) * 128)

    x_flat = x.reshape(N, C_in, HW)                # contiguous -> free reshape
    wmat = _fold_weights(w)                        # (4*C_out, 9*C_in)
    bvec = jnp.tile(b, 4).reshape(4 * C_out, 1)

    kernel = functools.partial(_upsample_kernel, H=H, W=W, pad=pad)

    # NOTE: at realistic (large) image sizes, tile the grid over H*W with a
    # one-row halo and set vmem_limit_bytes; at these shapes one image per
    # grid step fits comfortably in VMEM.
    y = pl.pallas_call(
        kernel,
        out_shape=jax.ShapeDtypeStruct((N, 4 * C_out, HW), x.dtype),
        grid_spec=pltpu.PrefetchScalarGridSpec(
            num_scalar_prefetch=0,
            grid=(N,),
            in_specs=[
                pl.BlockSpec((1, C_in, HW), lambda n: (n, 0, 0)),
                pl.BlockSpec((4 * C_out, 9 * C_in), lambda n: (0, 0)),
                pl.BlockSpec((4 * C_out, 1), lambda n: (0, 0)),
            ],
            out_specs=pl.BlockSpec((1, 4 * C_out, HW), lambda n: (n, 0, 0)),
        ),
        compiler_params=pltpu.CompilerParams(
            dimension_semantics=("parallel",)),    # batch elems independent
    )(x_flat, wmat, bvec)

    # Pixel-shuffle the 4 phase planes into the 2x-upsampled NCHW output
    # (wrapper-side layout plumbing, not compute).
    y = y.reshape(N, 2, 2, C_out, H, W)
    y = jnp.transpose(y, (0, 3, 4, 1, 5, 2))       # (N, C_out, H, 2, W, 2)
    return y.reshape(N, C_out, 2 * H, 2 * W)


def _reference(x, w, b):
    """Pure-JAX reference matching PyTorch ConvTranspose2d(k=4,s=2,p=1)+ReLU."""
    # conv_transpose(x, W; s, p) == conv(dilate(x, s), flip(W); pad = k-1-p)
    w_flip = w[:, :, ::-1, ::-1]                       # flip spatial taps
    w_oihw = jnp.transpose(w_flip, (1, 0, 2, 3))       # (C_out, C_in, 4, 4)
    y = jax.lax.conv_general_dilated(
        x, w_oihw, window_strides=(1, 1),
        padding=[(2, 2), (2, 2)],
        lhs_dilation=(2, 2),
        dimension_numbers=('NCHW', 'OIHW', 'NCHW'))
    y = y + b.reshape(1, -1, 1, 1)
    return jax.nn.relu(y)


if __name__ == "__main__":
    N, C_in, C_out, H, W = 2, 4, 4, 16, 16
    key = jax.random.PRNGKey(0)
    kx, kw, kb = jax.random.split(key, 3)

    # Deterministic params, roughly mimicking PyTorch's uniform conv init.
    bound = 1.0 / (C_in * 4 * 4) ** 0.5
    x = jax.random.normal(kx, (N, C_in, H, W), jnp.float32)
    w = jax.random.uniform(kw, (C_in, C_out, 4, 4), jnp.float32, -bound, bound)
    b = jax.random.uniform(kb, (C_out,), jnp.float32, -bound, bound)

    out = upsample(x, w, b)
    out = jax.block_until_ready(out)

    ref = _reference(x, w, b)
    assert out.shape == (N, C_out, 2 * H, 2 * W)
    assert jnp.allclose(out, ref, atol=1e-4, rtol=1e-4), "mismatch vs reference"

    print("KERNEL_OK")
</pallas_src>

<mosaic_0001>
module attributes {stable_mosaic.version = 11 : i64} {
  func.func @_upsample_kernel(%arg0: i32, %arg1: memref<1x4x256xf32, #tpu.memory_space<vmem>>, %arg2: memref<16x36xf32, #tpu.memory_space<vmem>>, %arg3: memref<16x1xf32, #tpu.memory_space<vmem>>, %arg4: memref<1x16x256xf32, #tpu.memory_space<vmem>>) attributes {dimension_semantics = [#tpu.dimension_semantics<parallel>], iteration_bounds = array<i64: 2>, scalar_prefetch = 0 : i64, scratch_operands = 0 : i64, tpu.core_type = #tpu.core_type<tc>, window_params = [{transform_indices = @transform_0, window_bounds = array<i64: 1, 4, 256>}, {pipeline_mode = #tpu.pipeline_mode<synchronous>, transform_indices = @transform_1, window_bounds = array<i64: 16, 36>}, {pipeline_mode = #tpu.pipeline_mode<synchronous>, transform_indices = @transform_2, window_bounds = array<i64: 16, 1>}, {transform_indices = @transform_3, window_bounds = array<i64: 1, 16, 256>}]} {
    %c0 = arith.constant 0 : index
    %c0_0 = arith.constant 0 : index
    %c0_1 = arith.constant 0 : index
    %0 = vector.load %arg1[%c0, %c0_0, %c0_1] : memref<1x4x256xf32, #tpu.memory_space<vmem>>, vector<1x4x256xf32>
    %1 = vector.shape_cast %0 : vector<1x4x256xf32> to vector<4x256xf32>
    %cst = arith.constant 0.000000e+00 : f32
    %2 = vector.broadcast %cst : f32 to vector<4x128xf32>
    %3 = tpu.concatenate %2, %1, %2 in 1 : vector<4x128xf32>, vector<4x256xf32>, vector<4x128xf32> -> vector<4x512xf32>
    %4 = tpu.iota {dimensions = array<i32: 1>} : vector<4x256xi32>
    %c16_i32 = arith.constant 16 : i32
    %c0_i32 = arith.constant 0 : i32
    %5 = arith.cmpi eq, %c16_i32, %c0_i32 : i32
    %c1_i32 = arith.constant 1 : i32
    %6 = arith.select %5, %c1_i32, %c16_i32 : i32
    %7 = vector.broadcast %6 : i32 to vector<4x256xi32>
    %8 = arith.remsi %4, %7 : vector<4x256xi32>
    %c0_i32_2 = arith.constant 0 : i32
    %9 = vector.broadcast %c0_i32_2 : i32 to vector<4x256xi32>
    %10 = arith.cmpi ne, %8, %9 : vector<4x256xi32>
    %c0_i32_3 = arith.constant 0 : i32
    %11 = vector.broadcast %c0_i32_3 : i32 to vector<4x256xi32>
    %12 = arith.cmpi slt, %8, %11 : vector<4x256xi32>
    %c0_i32_4 = arith.constant 0 : i32
    %13 = arith.cmpi slt, %6, %c0_i32_4 : i32
    %14 = vector.broadcast %13 : i1 to vector<4x256xi1>
    %15 = vector.broadcast %14 : vector<4x256xi1> to vector<4x256xi1>
    %16 = arith.xori %12, %15 : vector<4x256xi1>
    %17 = arith.andi %16, %10 : vector<4x256xi1>
    %18 = vector.broadcast %6 : i32 to vector<4x256xi32>
    %19 = arith.addi %8, %18 : vector<4x256xi32>
    %20 = arith.select %17, %19, %8 : vector<4x256xi1>, vector<4x256xi32>
    %c0_i32_5 = arith.constant 0 : i32
    %21 = vector.broadcast %c0_i32_5 : i32 to vector<4x256xi32>
    %22 = arith.cmpi ne, %20, %21 : vector<4x256xi32>
    %c15_i32 = arith.constant 15 : i32
    %23 = vector.broadcast %c15_i32 : i32 to vector<4x256xi32>
    %24 = arith.cmpi ne, %20, %23 : vector<4x256xi32>
    %25 = vector.extract_strided_slice %3 {offsets = [0, 111], sizes = [4, 256], strides = [1, 1]} : vector<4x512xf32> to vector<4x256xf32>
    %cst_6 = arith.constant 0.000000e+00 : f32
    %26 = vector.broadcast %cst_6 : f32 to vector<4x256xf32>
    %27 = arith.select %22, %25, %26 : vector<4x256xi1>, vector<4x256xf32>
    %28 = vector.extract_strided_slice %3 {offsets = [0, 112], sizes = [4, 256], strides = [1, 1]} : vector<4x512xf32> to vector<4x256xf32>
    %29 = vector.extract_strided_slice %3 {offsets = [0, 113], sizes = [4, 256], strides = [1, 1]} : vector<4x512xf32> to vector<4x256xf32>
    %cst_7 = arith.constant 0.000000e+00 : f32
    %30 = vector.broadcast %cst_7 : f32 to vector<4x256xf32>
    %31 = arith.select %24, %29, %30 : vector<4x256xi1>, vector<4x256xf32>
    %32 = vector.extract_strided_slice %3 {offsets = [0, 127], sizes = [4, 256], strides = [1, 1]} : vector<4x512xf32> to vector<4x256xf32>
    %cst_8 = arith.constant 0.000000e+00 : f32
    %33 = vector.broadcast %cst_8 : f32 to vector<4x256xf32>
    %34 = arith.select %22, %32, %33 : vector<4x256xi1>, vector<4x256xf32>
    %35 = vector.extract_strided_slice %3 {offsets = [0, 128], sizes = [4, 256], strides = [1, 1]} : vector<4x512xf32> to vector<4x256xf32>
    %36 = vector.extract_strided_slice %3 {offsets = [0, 129], sizes = [4, 256], strides = [1, 1]} : vector<4x512xf32> to vector<4x256xf32>
    %cst_9 = arith.constant 0.000000e+00 : f32
    %37 = vector.broadcast %cst_9 : f32 to vector<4x256xf32>
    %38 = arith.select %24, %36, %37 : vector<4x256xi1>, vector<4x256xf32>
    %39 = vector.extract_strided_slice %3 {offsets = [0, 143], sizes = [4, 256], strides = [1, 1]} : vector<4x512xf32> to vector<4x256xf32>
    %cst_10 = arith.constant 0.000000e+00 : f32
    %40 = vector.broadcast %cst_10 : f32 to vector<4x256xf32>
    %41 = arith.select %22, %39, %40 : vector<4x256xi1>, vector<4x256xf32>
    %42 = vector.extract_strided_slice %3 {offsets = [0, 144], sizes = [4, 256], strides = [1, 1]} : vector<4x512xf32> to vector<4x256xf32>
    %43 = vector.extract_strided_slice %3 {offsets = [0, 145], sizes = [4, 256], strides = [1, 1]} : vector<4x512xf32> to vector<4x256xf32>
    %cst_11 = arith.constant 0.000000e+00 : f32
    %44 = vector.broadcast %cst_11 : f32 to vector<4x256xf32>
    %45 = arith.select %24, %43, %44 : vector<4x256xi1>, vector<4x256xf32>
    %46 = tpu.concatenate %27, %28, %31, %34, %35, %38, %41, %42, %45 in 0 : vector<4x256xf32>, vector<4x256xf32>, vector<4x256xf32>, vector<4x256xf32>, vector<4x256xf32>, vector<4x256xf32>, vector<4x256xf32>, vector<4x256xf32>, vector<4x256xf32> -> vector<36x256xf32>
    %c0_12 = arith.constant 0 : index
    %c0_13 = arith.constant 0 : index
    %47 = vector.load %arg2[%c0_12, %c0_13] : memref<16x36xf32, #tpu.memory_space<vmem>>, vector<16x36xf32>
    %cst_14 = arith.constant dense<0.000000e+00> : vector<16x256xf32>
    %48 = tpu.matmul %47, %46, %cst_14 {dimension_numbers = #tpu.dot_dimension_numbers<[1], [0], [0], [1], [0, 0, 1, 1], [], []>} : vector<16x36xf32>, vector<36x256xf32>, vector<16x256xf32> -> vector<16x256xf32>
    %c0_15 = arith.constant 0 : index
    %c0_16 = arith.constant 0 : index
    %49 = vector.load %arg3[%c0_15, %c0_16] : memref<16x1xf32, #tpu.memory_space<vmem>>, vector<16x1xf32>
    %50 = vector.broadcast %49 : vector<16x1xf32> to vector<16x256xf32>
    %51 = arith.addf %48, %50 : vector<16x256xf32>
    %cst_17 = arith.constant 0.000000e+00 : f32
    %52 = vector.broadcast %cst_17 : f32 to vector<16x256xf32>
    %53 = arith.maximumf %51, %52 : vector<16x256xf32>
    %c0_18 = arith.constant 0 : index
    %c0_19 = arith.constant 0 : index
    %c0_20 = arith.constant 0 : index
    %54 = vector.load %arg4[%c0_18, %c0_19, %c0_20] : memref<1x16x256xf32, #tpu.memory_space<vmem>>, vector<1x16x256xf32>
    %55 = vector.shape_cast %54 : vector<1x16x256xf32> to vector<16x256xf32>
    %56 = vector.shape_cast %53 : vector<16x256xf32> to vector<1x16x256xf32>
    tpu.vector_store %arg4[%c0_18, %c0_19, %c0_20], %56 {strides = array<i32>} : memref<1x16x256xf32, #tpu.memory_space<vmem>>, vector<1x16x256xf32>,
    return
  }
  func.func @transform_0(%arg0: i32) -> (i32, i32, i32) {
    %c0_i32 = arith.constant 0 : i32
    %c0_i32_0 = arith.constant 0 : i32
    %c0_i32_1 = arith.constant 0 : i32
    return %arg0, %c0_i32, %c0_i32_0 : i32, i32, i32
  }
  func.func @transform_1(%arg0: i32) -> (i32, i32) {
    %c0_i32 = arith.constant 0 : i32
    %c0_i32_0 = arith.constant 0 : i32
    %c0_i32_1 = arith.constant 0 : i32
    return %c0_i32, %c0_i32_0 : i32, i32
  }
  func.func @transform_2(%arg0: i32) -> (i32, i32) {
    %c0_i32 = arith.constant 0 : i32
    %c0_i32_0 = arith.constant 0 : i32
    %c0_i32_1 = arith.constant 0 : i32
    return %c0_i32, %c0_i32_0 : i32, i32
  }
  func.func @transform_3(%arg0: i32) -> (i32, i32, i32) {
    %c0_i32 = arith.constant 0 : i32
    %c0_i32_0 = arith.constant 0 : i32
    %c0_i32_1 = arith.constant 0 : i32
    return %arg0, %c0_i32, %c0_i32_0 : i32, i32, i32
  }
}

</mosaic_0001>

<bundles_post_ra>
// kernel: tpu_custom_call.1
= control target key start
LH: loop header
LB: loop body
LE: loop exit
PB: predicated region body
PF: predicated region fallthrough
CT: control target
= control target key end

     0   :  { %8 = vsyncpa [#allocation3], 0  ;;  %s974_s0 = inlined_call_operand.vmem [shape: f32[2,4,256], index: 0, kind: input, shape index: {}]   ;;  %s975_s1 = inlined_call_operand.hbm [shape: f32[16,36], index: 1, kind: input, shape index: {}]   ;;  %s976_s2 = inlined_call_operand.vmem [shape: f32[16,1], index: 2, kind: input, shape index: {}]   ;;  %s977_s3 = inlined_call_operand.hbm [shape: f32[2,16,256], index: 3, kind: output, shape index: {}]  }
   0x1   :  { %9 = vsyncpa [#allocation4], 0 }
   0x2   :  { %11 = vsyncpa [#allocation4 + $0x1], 0  ;;  %s767_s12 = smov 0   ;;  %s769_s13 = smov 0  }
   0x3   :  { %s771_s14 = smov 0   ;;  %s773_s15 = smov 0  }
   0x4 LB: > { %s788_s16 = sadd.s32 4294967295, %s730_s15   ;;  %s544_s17 = sadd.s32 4294967294, %s730_s15   ;;  %s730_s15 = sphi %s773_s15, %s993_s15   ;;  %s726_s14 = sphi %s771_s14, %s992_s14   ;;  %s722_s13 = sphi %s769_s13, %s991_s13   ;;  %s718_s12 = sphi %s767_s12, %s990_s12  }
   0x5   : > { %s792_s18 = sadd.s32 1, %s730_s15   ;;  %s92_s19 = sadd.s32 1, %s726_s14 }
   0x6   : > { %s89_s20 = ssub.s32 %s730_s15, %s792_s18  ;;  %p102_p0 = scmp.ne.s32.totalorder %s726_s14, %s722_s13 }
   0x7   : > { %p90_p1 = scmp.eq.s32.totalorder %s89_s20, 0  ;;  %p103_p2 = scmp.eq.s32.totalorder %s788_s16, 1 }
   0x8   : > { %p108_p3 = scmp.ne.s32.totalorder %s722_s13, %s718_s12  ;;  %p109_p4 = scmp.eq.s32.totalorder %s544_s17, 1 }
   0x9   : > { %s803_s21 = scalar_select %p90_p1, %s726_s14, %s92_s19  }
   0xa   : > { %p805_p5 = por %p103_p2, %p102_p0  ;;  %p809_p6 = por %p109_p4, %p108_p3 }
   0xb   : > { %p545_p7 = scmp.ge.s32.totalorder %s730_s15, 1  ;;  %p116_p8 = scmp.lt.s32.totalorder %s730_s15, 3 }
   0xc   : > { %s979_s23 = scalar_select %p809_p6, 1, 0 }
   0xd   : > { %p588_p9 = scmp.eq.s32.totalorder %s788_s16, 0  ;;  %p816_p10 = pnand %p545_p7, %p116_p8 }
   0xe   : > { %s732_s25 = smov [#allocation2]  }
   0xf   : > { %s128_s26 = sshll.u32 %s732_s25, 4  ;;  %p580_p11 = pneg %p816_p10  ;;  %s129_s26 = int_to_ptr.vmem [resolvable:$true] %s128_s26 }
  0x10   : > { %s651_s27 = scalar_lea.vmem %s129_s26, 256  ;;  %p659_p3 = scmp.lt.s32.totalorder %s129_s26, %s129_s26 }
  0x11   : > { %p581_p12 = pnand %p588_p9, %p580_p11  ;;  %p652_p0 = scmp.ne.s32.totalorder %s129_s26, %s651_s27 }
  0x12   : > { %p660_p4 = scmp.lt.s32.totalorder %s651_s27, %s651_s27 }
  0x13   : > { %p642_p13 = pneg %p581_p12 }
  0x14   : > { %p661_p6 = por %p660_p4, %p659_p3 }
  0x15   : > { %p654_p1 = pnand %p652_p0, %p642_p13 }
  0x17   : > { %p655_p2 = pneg %p654_p1 }
  0x19   : > { %p662_p7 = pnand %p661_p6, %p655_p2 }
  0x1b   : > { %665 = shalt.err (!%p662_p7)
}
  0x1c   : > { %s733_s28 = smov 128   ;;  %s734_s29 = smov 8  }
  0x1d   : > { %583 = dma.hbm_to_vmem [thread:$0]  (!%p581_p12), %s975_s1, 256, %s129_s26, [#allocation3], %s733_s28, %s733_s28, %s734_s29  }
  0x1e   : > { %155 = sbr.rel (%p816_p10) target bundleno = 417 (0x1a1), region = 32 }
  0x23   : > { %709 = dma.done.wait (%p588_p9), [#allocation3], 256  }
  0x24   : > { %711 = vsyncadd (%p588_p9), [#allocation3], 4294967040  ;;  %v735_v0 = vmov 0.0   ;;  %s736_s5 = smov 127   ;;  %p179_p6 = scmp.lt.s32.totalorder %s788_s16, 1  ;;  %v744_v5 = vmov 0   ;;  %v188_v8 = vlaneseq }
  0x25   : > { %263 = vrot.lane.b32.xlu1 %v735_v0, %s736_s5  ;;  %435 = vmatprep.mubr.f32.mxu0 %v735_v0  ;;  %s737_s6 = smov 111   ;;  %s738_s8 = smov 113   ;;  %v298_v4 = vrot.slane %v735_v0, 4  ;;  %v347_v6 = vld [vmem:[%s976_s2 + $0x8] sm:$0xff]  ;;  %v346_v7 = vld [vmem:[%s976_s2] sm:$0xff]  ;;  %vm291_vm0 = vcmask 908288  }
  0x26   : > { %289 = vrot.lane.b32.xlu0 %v735_v0, %s737_s6  ;;  %441 = vmatprep.mubr.f32.mxu1 %v735_v0  ;;  %s180_s7 = scalar_select %p179_p6, %s788_s16, 1  ;;  %v189_v9 = vand.u32 127, %v188_v8  ;;  %vm335_vm2 = vcmask 1043456   ;;  %vm265_vm3 = vcmask 1039360   ;;  %vm278_vm5 = vcmask 924672  }
  0x27   : > { %s739_s19 = smov 112   ;;  %s740_s20 = smov 1   ;;  %638 = vset.pattern.permute.xlu1 %v744_v5  ;;  %637 = vset.pattern.permute.xlu0 %v744_v5  ;;  %vm330_vm8 = vcmask 916480   ;;  %vm252_vm9 = vcmask 7168   ;;  %vm239_vm10 = vcmask 121856   ;;  %vm226_vm11 = vcmask 138240  }
  0x28   : > { %s562_s9 = sshll.u32 %s180_s7, 3  ;;  %s741_s24 = smov 15   ;;  %v190_v11 = vadd.s32 128, %v189_v9  ;;  %v195_v22 = vand.u32 15, %v189_v9  ;;  %vm307_vm12 = vcmask 130048   ;;  %vm358_vm13 = vcmask 293888  }
  0x29   : > { %276 = vrot.lane.b32.xlu1 %v735_v0, %s738_s8  ;;  %s183_s17 = scalar_lea.vmem %s974_s0, %s562_s9  ;;  %s742_s25 = smov 17  }
  0x2a   : > { %v838_v1 = vld [vmem:[%s183_s17] sm:$0xff]  ;;  %s743_s26 = smov 16   ;;  %v202_v14 = vand.u32 15, %v190_v11  ;;  %vm877_vm4 = vcmp.ne.s32.totalorder %v195_v22, 15  ;;  %vm894_vm7 = vcmp.ne.s32.totalorder %v195_v22, 0  ;;  %s176_s4 = sand.u32 1, %s722_s13  }
  0x2b   : > { %v842_v2 = vcombine.high %v838_v1, %v838_v1  ;;  %v299_v3 = vrot.slane %v838_v1, 4 }
  0x2c   : > { %vm868_vm1 = vcmp.ne.s32.totalorder %v202_v14, 15  ;;  %vm888_vm6 = vcmp.ne.s32.totalorder %v202_v14, 0 }
  0x2d   : > { %261 = vrot.lane.b32.xlu1 %v842_v2, %s736_s5  ;;  %287 = vrot.lane.b32.xlu0 %v842_v2, %s737_s6 }
  0x31   : > { %259 = vrot.lane.b32.xlu1 %v838_v1, %s736_s5  ;;  %274 = vrot.lane.b32.xlu0 %v842_v2, %s738_s8  ;;  %s550_s5 = sshll.u32 %s176_s4, 5 }
  0x35   : > { %326 = vrot.lane.b32.xlu1 %v842_v2, %s739_s19  ;;  %285 = vrot.lane.b32.xlu0 %v838_v1, %s737_s6  ;;  %s178_s6 = scalar_lea.vmem [#allocation5], %s550_s5 }
  0x36   : > { %s470_s7 = sshll.u32 %s178_s6, 4  ;;  %s926_s7 = int_to_ptr.vmem [resolvable:$true] %s470_s7 }
  0x37   : > { %s666_s17 = scalar_lea.vmem %s926_s7, 512 }
  0x38   : > { %p667_p8 = scmp.ne.s32.totalorder %s926_s7, %s666_s17 }
  0x39   : > { %248 = vrot.lane.b32.xlu1 %v838_v1, %s740_s20  ;;  %272 = vrot.lane.b32.xlu0 %v838_v1, %s738_s8  ;;  %s563_s8 = sshll.u32 %s788_s16, 9  ;;  %s933_s16 = scalar_lea.sflag [#allocation4], %s176_s4 }
  0x3a   : > { %s931_s11 = scalar_lea.hbm %s977_s3, %s563_s8  ;;  %p668_p9 = pnand %p667_p8, %p805_p5 }
  0x3c   : > { %p669_p10 = pneg %p668_p9 }
  0x3d   : > { %324 = vrot.lane.b32.xlu1 %v299_v3, %s739_s19  ;;  %328 = vrot.lane.b32.xlu0 %v298_v4, %s739_s19  ;;  %s745_s19 = smov [#allocation5]  }
  0x41   : > { %250 = vrot.lane.b32.xlu0 %v842_v2, %s740_s20  ;;  %235 = vrot.lane.b32.xlu1 %v838_v1, %s741_s24 }
  0x45   : > { %246 = vrot.lane.b32.xlu0 %v735_v0, %s740_s20  ;;  %233 = vrot.lane.b32.xlu1 %v735_v0, %s741_s24  ;;  %s670_s20 = sshll.u32 %s745_s19, 4  ;;  %s671_s20 = int_to_ptr.vmem [resolvable:$false] %s670_s20 }
  0x46   : > { %p673_p11 = scmp.lt.s32.totalorder %s926_s7, %s671_s20 }
  0x49   : > { %237 = vrot.lane.b32.xlu0 %v842_v2, %s741_s24  ;;  %224 = vrot.lane.b32.xlu1 %v842_v2, %s742_s25  ;;  %s672_s24 = scalar_lea.vmem %s671_s20, 1024 }
  0x4a   : > { %p674_p12 = scmp.lt.s32.totalorder %s672_s24, %s666_s17 }
  0x4c   : > { %p675_p13 = por %p674_p12, %p673_p11 }
  0x4d   : > { %222 = vrot.lane.b32.xlu0 %v838_v1, %s742_s25  ;;  %303 = vrot.lane.b32.xlu1 %v299_v3, %s743_s26 }
  0x4e   : > { %p676_p0 = pnand %p675_p13, %p669_p10 }
  0x51   : > { %220 = vrot.lane.b32.xlu0 %v735_v0, %s742_s25  ;;  %301 = vrot.lane.b32.xlu1 %v298_v4, %s743_s26 }
  0x55   : > { %305 = vrot.lane.b32.xlu0 %v842_v2, %s743_s26  ;;  %355 = vperm.xlu1 %638, %v347_v6  }
  0x59   : > { %350 = vperm.xlu0 %637, %v346_v7  }
  0x97   : > { %v264_v10 = vpop.permute.xlu1 %263 }
  0x98   : > { %v290_v12 = vpop.permute.xlu0 %289 }
  0x9b   : > { %v277_v13 = vpop.permute.xlu1 %276 }
  0x9f   : > { %v262_v16 = vpop.permute.xlu1 %261  ;;  %v288_v17 = vpop.permute.xlu0 %287 }
  0xa0   : > { %v293_v18 = vsel %vm291_vm0, %v288_v17, %v290_v12  ;;  %v267_v27 = vsel %vm265_vm3, %v262_v16, %v264_v10 }
  0xa1   : > { %v297_v19 = vsel %vm868_vm1, %v293_v18, 0.0  ;;  %v271_v32 = vsel %vm868_vm1, %v267_v27, 0.0 }
  0xa2   : > { %553 = vmatprep.subr.msk.mxu0 %vm335_vm2, %v297_v19  ;;  %564 = vmatprep.subr.msk.mxu1 %vm335_vm2, %v297_v19  ;;  %v321_v38 = vrot.slane %v271_v32, 4 }
  0xa3   : > { %v260_v20 = vpop.permute.xlu1 %259  ;;  %v275_v21 = vpop.permute.xlu0 %274 }
  0xa4   : > { %v266_v29 = vsel %vm265_vm3, %v260_v20, %v262_v16  ;;  %v280_v34 = vsel %vm278_vm5, %v275_v21, %v277_v13  ;;  %v341_v50 = vsel %vm335_vm2, %v842_v2, %v321_v38  ;;  %v344_v16 = vld [vmem:[#allocation2] sm:$0xff] }
  0xa5   : > { %v270_v35 = vsel %vm877_vm4, %v266_v29, 0.0  ;;  %v284_v39 = vsel %vm888_vm6, %v280_v34, 0.0 }
  0xa6   : > { %v320_v42 = vrot.slane %v270_v35, 4 }
  0xa7   : > { %v327_v23 = vpop.permute.xlu1 %326  ;;  %v286_v24 = vpop.permute.xlu0 %285 }
  0xa8   : > { %v292_v26 = vsel %vm291_vm0, %v286_v24, %v288_v17  ;;  %v340_v51 = vsel %vm335_vm2, %v838_v1, %v320_v42  ;;  %v345_v17 = vld [vmem:[#allocation2 + $0x8] sm:$0xff] }
  0xa9   : > { %v296_v28 = vsel %vm877_vm4, %v292_v26, 0.0 }
  0xaa   : > { %554 = vmatpush1.msk.msra.mxu0 %vm335_vm2, %v296_v28  ;;  %569 = vmatpush1.msk.msra.mxu1 %vm335_vm2, %v296_v28 }
  0xab   : > { %v249_v30 = vpop.permute.xlu1 %248  ;;  %v273_v31 = vpop.permute.xlu0 %272 }
  0xac   : > { %v279_v37 = vsel %vm278_vm5, %v273_v31, %v275_v21 }
  0xad   : > { %v283_v43 = vsel %vm894_vm7, %v279_v37, 0.0 }
  0xaf   : > { %v325_v40 = vpop.permute.xlu1 %324  ;;  %v329_v41 = vpop.permute.xlu0 %328 }
  0xb0   : > { %v331_v44 = vsel %vm330_vm8, %v325_v40, %v327_v23  ;;  %v332_v45 = vsel %vm330_vm8, %v327_v23, %v329_v41 }
  0xb1   : > { %v343_v46 = vsel %vm335_vm2, %v284_v39, %v332_v45  ;;  %v342_v47 = vsel %vm335_vm2, %v283_v43, %v331_v44 }
  0xb2   : > { %395 = vmatprep.subr.mxu0 %v343_v46  ;;  %565 = vmatprep.subr.mxu1 %v343_v46 }
  0xb3   : > { %396 = vmatpush1.msra.mxu0 %v342_v47  ;;  %570 = vmatpush1.msra.mxu1 %v342_v47  ;;  %v251_v48 = vpop.permute.xlu0 %250  ;;  %v236_v49 = vpop.permute.xlu1 %235 }
  0xb4   : > { %397 = vmatprep.subr.mxu0 %v341_v50  ;;  %566 = vmatprep.subr.mxu1 %v341_v50  ;;  %v254_v52 = vsel %vm252_vm9, %v249_v30, %v251_v48 }
  0xb5   : > { %398 = vmatpush1.msra.mxu0 %v340_v51  ;;  %571 = vmatpush1.msra.mxu1 %v340_v51  ;;  %v258_v56 = vsel %vm888_vm6, %v254_v52, 0.0 }
  0xb6   : > { %v315_v62 = vrot.slane %v258_v56, 4 }
  0xb7   : > { %v247_v53 = vpop.permute.xlu0 %246  ;;  %v234_v54 = vpop.permute.xlu1 %233 }
  0xb8   : > { %v253_v55 = vsel %vm252_vm9, %v247_v53, %v249_v30  ;;  %v240_v58 = vsel %vm239_vm10, %v234_v54, %v236_v49 }
  0xb9   : > { %v257_v57 = vsel %vm894_vm7, %v253_v55, 0.0  ;;  %v244_v63 = vsel %vm877_vm4, %v240_v58, 0.0 }
  0xba   : > { %v314_v59 = vrot.slane %v257_v57, 4 }
  0xbb   : > { %v238_v60 = vpop.permute.xlu0 %237  ;;  %v225_v61 = vpop.permute.xlu1 %224 }
  0xbc   : > { %v241_v0 = vsel %vm239_vm10, %v236_v49, %v238_v60  ;;  %v338_v5 = vsel %vm335_vm2, %v244_v63, %v314_v59 }
  0xbd   : > { %v245_v1 = vsel %vm868_vm1, %v241_v0, 0.0 }
  0xbe   : > { %v339_v2 = vsel %vm335_vm2, %v245_v1, %v315_v62 }
  0xbf   : > { %399 = vmatprep.subr.mxu0 %v339_v2  ;;  %567 = vmatprep.subr.mxu1 %v339_v2  ;;  %v223_v3 = vpop.permute.xlu0 %222  ;;  %v304_v4 = vpop.permute.xlu1 %303 }
  0xc0   : > { %400 = vmatpush1.msra.mxu0 %v338_v5  ;;  %572 = vmatpush1.msra.mxu1 %v338_v5  ;;  %v228_v9 = vsel %vm226_vm11, %v223_v3, %v225_v61 }
  0xc1   : > { %v232_v13 = vsel %vm888_vm6, %v228_v9, 0.0 }
  0xc3   : > { %v221_v6 = vpop.permute.xlu0 %220  ;;  %v302_v8 = vpop.permute.xlu1 %301 }
  0xc4   : > { %v227_v7 = vsel %vm226_vm11, %v221_v6, %v223_v3  ;;  %v308_v11 = vsel %vm307_vm12, %v302_v8, %v304_v4 }
  0xc5   : > { %v231_v10 = vsel %vm894_vm7, %v227_v7, 0.0 }
  0xc6   : > { %v336_v18 = vsel %vm335_vm2, %v231_v10, %v308_v11 }
  0xc7   : > { %v306_v12 = vpop.permute.xlu0 %305 }
  0xc8   : > { %v309_v14 = vsel %vm307_vm12, %v304_v4, %v306_v12 }
  0xc9   : > { %v337_v15 = vsel %vm335_vm2, %v232_v13, %v309_v14 }
  0xca   : > { %401 = vmatprep.subr.mxu0 %v337_v15  ;;  %568 = vmatprep.subr.mxu1 %v337_v15 }
  0xcb   : > { %402 = vmatpush1.msra.mxu0 %v336_v18  ;;  %573 = vmatpush1.msra.mxu1 %v336_v18 }
  0xcc   : > { %555 = vmatmul.mubr.msk.f32.vlgmr.msra.gmra.mxu0 %vm358_vm13, %v344_v16  ;;  %556 = vmatmul.mubr.msk.f32.vlgmr.msra.gmra.mxu1 %vm358_vm13, %v345_v17 }
  0xd0   : > { %v356_v19 = vpop.permute.xlu1 %355 }
  0xd4   : > { %v351_v20 = vpop.permute.xlu0 %350 }
 0x18c   : > { %v437_v21 = vpop.f32.mrf.mxu0  ;;  %v443_v22 = vpop.f32.mrf.mxu1 }
 0x18d   : > { %v444_v23 = vadd.f32 %v443_v22, %v356_v19  ;;  %v438_v24 = vadd.f32 %v437_v21, %v351_v20 }
 0x18e   : > { %v439_v25 = vpop.f32.mrf.mxu0  ;;  %v445_v26 = vpop.f32.mrf.mxu1 }
 0x18f   : > { %v450_v27 = vmax.f32 %v444_v23, 0.0  ;;  %v448_v28 = vmax.f32 %v438_v24, 0.0  ;;  %v440_v29 = vadd.f32 %v439_v25, %v351_v20  ;;  %v446_v30 = vadd.f32 %v445_v26, %v356_v19 }
 0x191   : > { %454 = vst [vmem:[%s178_s6 + $0x10] sm:$0xff] %v450_v27  ;;  %452 = vst [vmem:[%s178_s6] sm:$0xff] %v448_v28  ;;  %v449_v31 = vmax.f32 %v440_v29, 0.0  ;;  %v451_v32 = vmax.f32 %v446_v30, 0.0 }
 0x193   : > { %453 = vst [vmem:[%s178_s6 + $0x8] sm:$0xff] %v449_v31  ;;  %455 = vst [vmem:[%s178_s6 + $0x18] sm:$0xff] %v451_v32 }
 0x194   : > { %679 = shalt.err (!%p676_p0)
}
 0x195   : > { %s680_s25 = scalar_lea.hbm %s931_s11, 512  ;;  %s684_s29 = scalar_lea.hbm %s977_s3, 1024 }
 0x196   : > { %p681_p1 = scmp.ne.s32.totalorder %s931_s11, %s680_s25  ;;  %p685_p4 = scmp.lt.s32.totalorder %s931_s11, %s977_s3 }
 0x197   : > { %p686_p7 = scmp.lt.s32.totalorder %s684_s29, %s680_s25 }
 0x198   : > { %p682_p2 = pnand %p681_p1, %p805_p5 }
 0x199   : > { %p687_p6 = por %p686_p7, %p685_p4 }
 0x19a   : > { %p683_p3 = pneg %p682_p2 }
 0x19c   : > { %p688_p8 = pnand %p687_p6, %p683_p3 }
 0x19e   : > { %691 = shalt.err (!%p688_p8)
}
 0x19f   : > { %s746_s5 = smov 256  }
 0x1a0   : > { %578 = dma.vmem_to_hbm [thread:$0]  (%p805_p5), %s926_s7, 512, %s931_s11, %s933_s16, %s746_s5, %s746_s5, %s743_s26  }
 0x1a1 PF: > { %p590_p9 = scmp.ge.s32.totalorder %s730_s15, 2  ;;  %s485_s6 = sand.u32 1, %s718_s12  }
 0x1a2   : > { %p989_p10 = scmp.ne.s32.totalorder %s979_s23, 0  ;;  %s486_s8 = scalar_lea.sflag [#allocation4], %s485_s6 }
 0x1a4   : > { %p585_p11 = pnand %p590_p9, %p989_p10 }
 0x1a6   : > { %p586_p12 = pneg %p585_p11 }
 0x1a8   : > { %713 = dma.done.wait (%p586_p12), %s486_s8, 512  }
 0x1a9   : > { %715 = vsyncadd (%p586_p12), %s486_s8, 4294966784  ;;  %p14_p13 = scmp.ge.s32.totalorder %s792_s18, 4   ;;  %s990_s12 = smov %s722_s13 }
 0x1aa   : > { %s991_s13 = smov %s726_s14  ;;  %s992_s14 = smov %s803_s21 }
 0x1ab   : > { %s993_s15 = smov %s792_s18  ;;  %16 = sbr.rel (!%p14_p13) target bundleno = 4 (0x4), region = 72 }
 0x1b0   :  { %491 = vsyncpa [#allocation3], 1 }
 0x1b1   :  { %493 = vsyncpa [#allocation3 + $0x1], 1 }
 0x1b2   :  { %494 = vsyncpa [#allocation4], 1 }
 0x1b3   :  { %496 = vsyncpa [#allocation4 + $0x1], 1 }

</bundles_post_ra>
